<compile_context>
chip_gen: v7x
topology: tpu7x:2x2x1
jax: 0.10.0
libtpu: 0.0.40
codegen_flags: <defaults>
</compile_context>

<pallas_src>
import math

import jax
import jax.numpy as jnp
import numpy as np
from jax.experimental import pallas as pl
from jax.experimental.pallas import tpu as pltpu


_TARGET_BLOCK_BYTES = 2 * 1024 * 1024  # ~2 MiB: >=85% of HBM roofline on v5e/v6e/v7x,
                                        # fits default scoped VMEM with double buffering.


def _block_diag(m, g):
    """g copies of `m` along the diagonal (host-side, tiny)."""
    if g == 1:
        return m
    r, c = m.shape
    out = jnp.zeros((g * r, g * c), m.dtype)
    for s in range(g):
        out = out.at[s * r:(s + 1) * r, s * c:(s + 1) * c].set(m)
    return out


def se_module_pallas(x, w1t, b1, w2, b2):
    """Fused SE forward: out = x * fc2(relu(fc1(avg_pool(x)))).

    Args:
      x:   (N, C, H, W)
      w1t: (C, C//r)   == PyTorch fc[0].weight[:, :, 0, 0].T
      b1:  (1, C//r)   == PyTorch fc[0].bias[None, :]
      w2:  (C, C//r)   == PyTorch fc[2].weight[:, :, 0, 0]
      b2:  (C, 1)      == PyTorch fc[2].bias[:, None]
    """
    N, C, H, W = x.shape
    HW = H * W
    Cr = w1t.shape[1]
    itemsize = np.dtype(x.dtype).itemsize

    # --- fold g samples into the sublane axis so g*C is a multiple of 8 -----
    g0 = (8 * C) // math.gcd(8, C) // C          # lcm(C, 8) // C  (<= 8)
    g = g0 if (N % g0 == 0) else 1               # fallback is still correct, just padded
    NG = N // g
    GC = g * C

    # --- lane density: pad HW up to a multiple of 128 (pool uses true HW) ---
    HWp = pl.cdiv(HW, 128) * 128
    x3 = x.reshape(NG, GC, HW)                   # contiguous host reshape
    if HWp != HW:
        x3 = jnp.pad(x3, ((0, 0), (0, 0), (0, HWp - HW)))

    # --- block-diagonal g-fold weights (host-side, tiny) --------------------
    w1e = _block_diag(w1t, g)                    # (GC, g*Cr)
    w2e = _block_diag(w2, g)                     # (GC, g*Cr)
    b1e = jnp.tile(b1, (1, g))                   # (1,  g*Cr)
    b2e = jnp.tile(b2, (g, 1))                   # (GC, 1)
    GCr = g * Cr

    # --- batch sample-groups per grid step up to ~2 MiB blocks --------------
    group_bytes = GC * HWp * itemsize
    g_blk = max(1, _TARGET_BLOCK_BYTES // group_bytes)
    if NG >= 2:
        g_blk = min(g_blk, pl.cdiv(NG, 2))       # keep >=2 grid steps (v7x: 2 TCs/chip)
    g_blk = int(min(g_blk, NG))
    grid = (pl.cdiv(NG, g_blk),)                 # ragged tail is safe: padded rows only
                                                 # affect padded rows (dropped on store)

    inv_hw = 1.0 / float(HW)

    def _se_kernel(x_ref, w1_ref, b1_ref, w2_ref, b2_ref, o_ref):
        x_blk = x_ref[...]                                              # (g_blk, GC, HWp)
        # squeeze: global average pool over H*W (lane reduce), f32 accumulation
        pooled = jnp.sum(x_blk.astype(jnp.float32), axis=-1, keepdims=True) * inv_hw
        # excitation MLP on the VPU; block-diag weights apply all g folded samples at once
        w1 = w1_ref[...].astype(jnp.float32)                            # (GC, GCr)
        h = jnp.sum(w1[None, :, :] * pooled, axis=1, keepdims=True)     # (g_blk, 1, GCr)
        h = jnp.maximum(h + b1_ref[...].astype(jnp.float32)[None, :, :], 0.0)
        w2v = w2_ref[...].astype(jnp.float32)                           # (GC, GCr)
        gate = jnp.sum(w2v[None, :, :] * h, axis=-1, keepdims=True)     # (g_blk, GC, 1)
        gate = gate + b2_ref[...].astype(jnp.float32)[None, :, :]
        # channel-wise rescale in x's native dtype (only the tiny gate is cast)
        o_ref[...] = x_blk * gate.astype(o_ref.dtype)

    out = pl.pallas_call(
        _se_kernel,
        out_shape=jax.ShapeDtypeStruct((NG, GC, HWp), x.dtype),
        grid_spec=pltpu.PrefetchScalarGridSpec(
            num_scalar_prefetch=0,
            grid=grid,
            in_specs=[
                # Lane- and sublane-dense data block; ~2 MiB per grid step.
                pl.BlockSpec((g_blk, GC, HWp), lambda i: (i, 0, 0)),
                # Tiny excitation weights: full-array blocks, same block every step
                # (Pallas skips the re-DMA when the block index is unchanged).
                pl.BlockSpec((GC, GCr), lambda i: (0, 0)),
                pl.BlockSpec((1, GCr), lambda i: (0, 0)),
                pl.BlockSpec((GC, GCr), lambda i: (0, 0)),
                pl.BlockSpec((GC, 1), lambda i: (0, 0)),
            ],
            out_specs=pl.BlockSpec((g_blk, GC, HWp), lambda i: (i, 0, 0)),
        ),
        compiler_params=pltpu.CompilerParams(
            # Sample-group blocks are independent -> shard across TensorCores (v7x).
            dimension_semantics=("parallel",),
        ),
    )(x3, w1e, b1e, w2e, b2e)

    if HWp != HW:
        out = out[:, :, :HW]
    return out.reshape(N, C, H, W)


def _se_reference(x, w1t, b1, w2, b2):
    pooled = jnp.mean(x, axis=(2, 3))                        # (N, C)
    h = jnp.maximum(pooled @ w1t + b1.reshape(1, -1), 0.0)   # (N, Cr)
    gate = h @ w2.T + b2.reshape(1, -1)                      # (N, C)
    return x * gate[:, :, None, None]


if __name__ == "__main__":
    key = jax.random.PRNGKey(0)
    k_x, k_w1, k_b1, k_w2, k_b2 = jax.random.split(key, 5)

    N, C, H, W = 2, 4, 16, 16
    reduction = 4
    Cr = C // reduction

    x = jax.random.normal(k_x, (N, C, H, W), dtype=jnp.float32)
    w1t = jax.random.normal(k_w1, (C, Cr), dtype=jnp.float32) * 0.5
    b1 = jax.random.normal(k_b1, (1, Cr), dtype=jnp.float32) * 0.1
    w2 = jax.random.normal(k_w2, (C, Cr), dtype=jnp.float32) * 0.5
    b2 = jax.random.normal(k_b2, (C, 1), dtype=jnp.float32) * 0.1

    y = se_module_pallas(x, w1t, b1, w2, b2)
    jax.block_until_ready(y)

    y_ref = _se_reference(x, w1t, b1, w2, b2)
    np.testing.assert_allclose(np.asarray(y), np.asarray(y_ref), rtol=1e-5, atol=1e-5)

    assert y.shape == x.shape and y.dtype == x.dtype
    print("KERNEL_OK")
</pallas_src>

<mosaic_0001>
module attributes {stable_mosaic.version = 11 : i64} {
  func.func @_se_kernel(%arg0: i32, %arg1: memref<1x8x256xf32, #tpu.memory_space<vmem>>, %arg2: memref<8x2xf32, #tpu.memory_space<vmem>>, %arg3: memref<1x2xf32, #tpu.memory_space<vmem>>, %arg4: memref<8x2xf32, #tpu.memory_space<vmem>>, %arg5: memref<8x1xf32, #tpu.memory_space<vmem>>, %arg6: memref<1x8x256xf32, #tpu.memory_space<vmem>>) attributes {dimension_semantics = [#tpu.dimension_semantics<parallel>], iteration_bounds = array<i64: 1>, scalar_prefetch = 0 : i64, scratch_operands = 0 : i64, tpu.core_type = #tpu.core_type<tc>, window_params = [{transform_indices = @transform_0, window_bounds = array<i64: 1, 8, 256>}, {pipeline_mode = #tpu.pipeline_mode<synchronous>, transform_indices = @transform_1, window_bounds = array<i64: 8, 2>}, {pipeline_mode = #tpu.pipeline_mode<synchronous>, transform_indices = @transform_2, window_bounds = array<i64: 1, 2>}, {pipeline_mode = #tpu.pipeline_mode<synchronous>, transform_indices = @transform_3, window_bounds = array<i64: 8, 2>}, {pipeline_mode = #tpu.pipeline_mode<synchronous>, transform_indices = @transform_4, window_bounds = array<i64: 8, 1>}, {transform_indices = @transform_5, window_bounds = array<i64: 1, 8, 256>}]} {
    %c0 = arith.constant 0 : index
    %c0_0 = arith.constant 0 : index
    %c0_1 = arith.constant 0 : index
    %0 = vector.load %arg1[%c0, %c0_0, %c0_1] : memref<1x8x256xf32, #tpu.memory_space<vmem>>, vector<1x8x256xf32>
    %cst = arith.constant dense<0.000000e+00> : vector<1x8xf32>
    %1 = vector.multi_reduction <add>, %0, %cst [2] : vector<1x8x256xf32> to vector<1x8xf32>
    %2 = vector.shape_cast %1 : vector<1x8xf32> to vector<1x8x1xf32>
    %cst_2 = arith.constant 3.906250e-03 : f32
    %3 = vector.broadcast %cst_2 : f32 to vector<1x8x1xf32>
    %4 = arith.mulf %2, %3 : vector<1x8x1xf32>
    %c0_3 = arith.constant 0 : index
    %c0_4 = arith.constant 0 : index
    %5 = vector.load %arg2[%c0_3, %c0_4] : memref<8x2xf32, #tpu.memory_space<vmem>>, vector<8x2xf32>
    %6 = vector.shape_cast %5 : vector<8x2xf32> to vector<1x8x2xf32>
    %7 = vector.broadcast %4 : vector<1x8x1xf32> to vector<1x8x2xf32>
    %8 = arith.mulf %6, %7 : vector<1x8x2xf32>
    %cst_5 = arith.constant dense<0.000000e+00> : vector<1x2xf32>
    %9 = vector.multi_reduction <add>, %8, %cst_5 [1] : vector<1x8x2xf32> to vector<1x2xf32>
    %10 = vector.shape_cast %9 : vector<1x2xf32> to vector<1x1x2xf32>
    %c0_6 = arith.constant 0 : index
    %c0_7 = arith.constant 0 : index
    %11 = vector.load %arg3[%c0_6, %c0_7] : memref<1x2xf32, #tpu.memory_space<vmem>>, vector<1x2xf32>
    %12 = vector.shape_cast %11 : vector<1x2xf32> to vector<1x1x2xf32>
    %13 = arith.addf %10, %12 : vector<1x1x2xf32>
    %cst_8 = arith.constant 0.000000e+00 : f32
    %14 = vector.broadcast %cst_8 : f32 to vector<1x1x2xf32>
    %15 = arith.maximumf %13, %14 : vector<1x1x2xf32>
    %c0_9 = arith.constant 0 : index
    %c0_10 = arith.constant 0 : index
    %16 = vector.load %arg4[%c0_9, %c0_10] : memref<8x2xf32, #tpu.memory_space<vmem>>, vector<8x2xf32>
    %17 = vector.shape_cast %16 : vector<8x2xf32> to vector<1x8x2xf32>
    %18 = vector.broadcast %15 : vector<1x1x2xf32> to vector<1x8x2xf32>
    %19 = arith.mulf %17, %18 : vector<1x8x2xf32>
    %cst_11 = arith.constant dense<0.000000e+00> : vector<1x8xf32>
    %20 = vector.multi_reduction <add>, %19, %cst_11 [2] : vector<1x8x2xf32> to vector<1x8xf32>
    %21 = vector.shape_cast %20 : vector<1x8xf32> to vector<1x8x1xf32>
    %c0_12 = arith.constant 0 : index
    %c0_13 = arith.constant 0 : index
    %22 = vector.load %arg5[%c0_12, %c0_13] : memref<8x1xf32, #tpu.memory_space<vmem>>, vector<8x1xf32>
    %23 = vector.shape_cast %22 : vector<8x1xf32> to vector<1x8x1xf32>
    %24 = arith.addf %21, %23 : vector<1x8x1xf32>
    %25 = vector.broadcast %24 : vector<1x8x1xf32> to vector<1x8x256xf32>
    %26 = arith.mulf %0, %25 : vector<1x8x256xf32>
    %c0_14 = arith.constant 0 : index
    %c0_15 = arith.constant 0 : index
    %c0_16 = arith.constant 0 : index
    %27 = vector.load %arg6[%c0_14, %c0_15, %c0_16] : memref<1x8x256xf32, #tpu.memory_space<vmem>>, vector<1x8x256xf32>
    tpu.vector_store %arg6[%c0_14, %c0_15, %c0_16], %26 {strides = array<i32>} : memref<1x8x256xf32, #tpu.memory_space<vmem>>, vector<1x8x256xf32>,
    return
  }
  func.func @transform_0(%arg0: i32) -> (i32, i32, i32) {
    %c0_i32 = arith.constant 0 : i32
    %c0_i32_0 = arith.constant 0 : i32
    %c0_i32_1 = arith.constant 0 : i32
    return %arg0, %c0_i32, %c0_i32_0 : i32, i32, i32
  }
  func.func @transform_1(%arg0: i32) -> (i32, i32) {
    %c0_i32 = arith.constant 0 : i32
    %c0_i32_0 = arith.constant 0 : i32
    %c0_i32_1 = arith.constant 0 : i32
    return %c0_i32, %c0_i32_0 : i32, i32
  }
  func.func @transform_2(%arg0: i32) -> (i32, i32) {
    %c0_i32 = arith.constant 0 : i32
    %c0_i32_0 = arith.constant 0 : i32
    %c0_i32_1 = arith.constant 0 : i32
    return %c0_i32, %c0_i32_0 : i32, i32
  }
  func.func @transform_3(%arg0: i32) -> (i32, i32) {
    %c0_i32 = arith.constant 0 : i32
    %c0_i32_0 = arith.constant 0 : i32
    %c0_i32_1 = arith.constant 0 : i32
    return %c0_i32, %c0_i32_0 : i32, i32
  }
  func.func @transform_4(%arg0: i32) -> (i32, i32) {
    %c0_i32 = arith.constant 0 : i32
    %c0_i32_0 = arith.constant 0 : i32
    %c0_i32_1 = arith.constant 0 : i32
    return %c0_i32, %c0_i32_0 : i32, i32
  }
  func.func @transform_5(%arg0: i32) -> (i32, i32, i32) {
    %c0_i32 = arith.constant 0 : i32
    %c0_i32_0 = arith.constant 0 : i32
    %c0_i32_1 = arith.constant 0 : i32
    return %arg0, %c0_i32, %c0_i32_0 : i32, i32, i32
  }
}

</mosaic_0001>

<bundles_post_ra>
// kernel: tpu_custom_call.1
= control target key start
LH: loop header
LB: loop body
LE: loop exit
PB: predicated region body
PF: predicated region fallthrough
CT: control target
= control target key end

     0   :  { %s166_s0 = inlined_call_operand.vmem [shape: f32[1,8,256], index: 0, kind: input, shape index: {}]   ;;  %s167_s1 = inlined_call_operand.vmem [shape: f32[8,2], index: 1, kind: input, shape index: {}]   ;;  %s168_s2 = inlined_call_operand.vmem [shape: f32[1,2], index: 2, kind: input, shape index: {}]   ;;  %s169_s3 = inlined_call_operand.vmem [shape: f32[8,2], index: 3, kind: input, shape index: {}]   ;;  %s170_s4 = inlined_call_operand.vmem [shape: f32[8,1], index: 4, kind: input, shape index: {}]   ;;  %s171_s5 = inlined_call_operand.hbm [shape: f32[1,8,256], index: 5, kind: output, shape index: {}]  }
   0x1   :  { %v21_v0 = vld [vmem:[%s166_s0] sm:$0xff]  ;;  %v22_v1 = vld [vmem:[%s166_s0 + $0x8] sm:$0xff] }
   0x2   :  { %v23_v2 = vadd.f32 %v22_v1, %v21_v0 }
   0x3   :  { %10 = vsyncpa [#allocation3], 0  ;;  %v27_v3 = vld [vmem:[%s167_s1] sm:$0xff]  ;;  %vm29_vm0 = vcmask 15360   ;;  %v41_v11 = vlaneseq  ;;  %v102_v24 = vmov 0  }
   0x4   :  { %24 = vadd.xlane.f32.xlu0 %v23_v2  ;;  %v37_v15 = vld [vmem:[%s168_s2] sm:$0x1]  ;;  %76 = vset.pattern.permute.xlu1 %v102_v24  ;;  %s103_s2 = smov [#allocation2]  }
   0x5   :  { %v42_v14 = vshrl.u32 %v41_v11, 7  ;;  %v40_v20 = vld [vmem:[%s169_s3] sm:$0xff]  ;;  %77 = vset.pattern.permute.xlu0 %v102_v24  ;;  %s66_s28 = sshll.u32 %s103_s2, 4  ;;  %s67_s28 = int_to_ptr.vmem [resolvable:$true] %s66_s28 }
   0x6   :  { %v49_v25 = vld [vmem:[%s170_s4] sm:$0xff]  ;;  %s78_s3 = scalar_lea.vmem %s67_s28, 256  ;;  %p83_p1 = scmp.lt.s32.totalorder %s67_s28, %s67_s28 }
   0x7   :  { %v43_v18 = vsub.s32 0, %v42_v14  ;;  %p79_p0 = scmp.ne.s32.totalorder %s67_s28, %s78_s3  ;;  %p84_p2 = scmp.lt.s32.totalorder %s78_s3, %s78_s3 }
   0x9   :  { %p85_p3 = por %p84_p2, %p83_p1 }
   0xb   :  { %p86_p4 = pnand %p85_p3, %p79_p0 }
  0x91   :  { %v25_v4 = vpop.xlane.xlu0 %24 }
  0x92   :  { %v26_v5 = vmul.f32 0.00390625, %v25_v4 }
  0x94   :  { %v28_v6 = vmul.f32 %v27_v3, %v26_v5 }
  0x96   :  { %v30_v7 = vsel %vm29_vm0, %v28_v6, 0.0 }
  0x97   :  { %v31_v8 = vrot.slane %v30_v7, 4 }
  0x99   :  { %v32_v9 = vadd.f32 %v31_v8, %v30_v7 }
  0x9b   :  { %v33_v10 = vrot.slane %v32_v9, 2 }
  0x9d   :  { %v34_v12 = vadd.f32 %v33_v10, %v32_v9 }
  0x9f   :  { %v35_v13 = vrot.slane %v34_v12, 1 }
  0xa1   :  { %v36_v16 = vadd.f32 %v35_v13, %v34_v12 }
  0xa3   :  { %v38_v17 = vadd.f32 %v37_v15, %v36_v16 }
  0xa5   :  { %v39_v19 = vmax.f32 %v38_v17, 0.0 }
  0xa7   :  { %v44_v21 = vrot.slane %v39_v19, %v43_v18 }
  0xa9   :  { %v45_v22 = vmul.f32 %v44_v21, %v40_v20 }
  0xab   :  { %v46_v23 = vsel %vm29_vm0, %v45_v22, 0.0 }
  0xac   :  { %47 = vadd.xlane.f32.xlu0 %v46_v23 }
 0x139   :  { %v48_v26 = vpop.xlane.xlu0 %47 }
 0x13a   :  { %v50_v27 = vadd.f32 %v49_v25, %v48_v26 }
 0x13c   :  { %53 = vperm.xlu1 %76, %v50_v27  }
 0x1bb   :  { %v54_v28 = vpop.permute.xlu1 %53 }
 0x1bc   :  { %v56_v29 = vmul.f32 %v54_v28, %v21_v0  ;;  %v57_v30 = vmul.f32 %v54_v28, %v22_v1 }
 0x1be   :  { %58 = vst [vmem:[#allocation2] sm:$0xff] %v56_v29  ;;  %59 = vst [vmem:[#allocation2 + $0x8] sm:$0xff] %v57_v30 }
 0x1bf   :  { %89 = shalt.err (!%p86_p4)
}
 0x1c0   :  { %s90_s30 = scalar_lea.hbm %s171_s5, 256 }
 0x1c1   :  { %p91_p5 = scmp.ne.s32.totalorder %s171_s5, %s90_s30  ;;  %p94_p6 = scmp.lt.u32.totalorder %s90_s30, %s171_s5 }
 0x1c3   :  { %p96_p7 = pnand %p94_p6, %p91_p5 }
 0x1c5   :  { %99 = shalt.err (!%p96_p7)
}
 0x1c6   :  { %69 = dma.vmem_to_hbm [thread:$0]  %s67_s28, 256, %s171_s5, [#allocation3]  }
 0x1c7   :  { %100 = dma.done.wait [#allocation3], 256  }
 0x1c8   :  { %101 = vsyncadd [#allocation3], 4294967040 }
 0x1c9   :  { %73 = vsyncpa [#allocation3], 1 }

</bundles_post_ra>
